<compile_context>
chip_gen: v6e
topology: v6e:2x2x1
jax: 0.10.0
libtpu: 0.0.40
codegen_flags: <defaults>
</compile_context>

<pallas_src>
import jax
import jax.numpy as jnp
from jax.experimental import pallas as pl
from jax.experimental.pallas import tpu as pltpu


def rnn_seq_kernel(xcat_ref, h0_ref, w1a_ref, w1h_ref, w2_ref,
                   out_ref, hlast_ref, h_carry):
    """One grid step = one RNN time step for one batch block."""
    t = pl.program_id(1)                               # time axis (innermost, "arbitrary")

    # First time step of this batch block: load the initial hidden state.
    @pl.when(t == 0)
    def _():
        h_carry[...] = h0_ref[...]

    f32 = jnp.float32
    x = xcat_ref[0]                                    # (Bblk, A_pad) = [cat|input|1|0-pad]

    # Stage 1: fused i2h + i2o (+ their biases via the ones lane), split into the
    # external-input slab and the carried-hidden slab (no per-step concatenate).
    #   s1 = [ new_hidden | i2o_output | 1 | 0-pad ]    (Bblk, S1_pad)
    s1 = jnp.dot(x, w1a_ref[...], preferred_element_type=f32)
    s1 = s1 + jnp.dot(h_carry[...], w1h_ref[...], preferred_element_type=f32)

    # Stage 2: fused o2o + bias (bias row is driven by the "1" carrier lane of s1);
    # padded logit lanes carry a -1e30 bias so exp() kills them in the softmax.
    logits = jnp.dot(s1, w2_ref[...], preferred_element_type=f32)

    # dropout(p=0.1): identity (inference mode).

    # Stable log_softmax over the lane dim.
    m = jnp.max(logits, axis=1, keepdims=True)
    shifted = logits - m
    lse = jnp.log(jnp.sum(jnp.exp(shifted), axis=1, keepdims=True))
    out_ref[0] = shifted - lse                         # lane-dense (padded) store

    # Carry the full s1 slab: W1h has nonzero rows only for the hidden lanes, so the
    # i2o/carrier/pad lanes are ignored next step.  Both stores are lane-dense (B,128).
    h_carry[...] = s1
    hlast_ref[...] = s1


def _build_fused_weights(params, n_cat, in_sz, hid_sz, out_sz):
    """Fuse the three PyTorch Linears + biases into three padded MXU weight slabs."""
    a_sz = n_cat + in_sz + 1                           # [category | input | ones]
    a_pad = pl.cdiv(a_sz, 128) * 128
    s1_pad = pl.cdiv(hid_sz + out_sz + 1, 128) * 128   # [hidden | i2o out | 1 | pad]
    n_pad = pl.cdiv(out_sz, 128) * 128

    ci = n_cat + in_sz
    w_i2h_t = params["w_i2h"].T                        # (cin, hid), cin = ci + hid
    w_i2o_t = params["w_i2o"].T                        # (cin, out)

    # Stage-1 weight, external slab: rows = [category|input|1|pad].
    w1a = jnp.zeros((a_pad, s1_pad), jnp.float32)
    w1a = w1a.at[:ci, :hid_sz].set(w_i2h_t[:ci])
    w1a = w1a.at[:ci, hid_sz:hid_sz + out_sz].set(w_i2o_t[:ci])
    w1a = w1a.at[ci, :hid_sz].set(params["b_i2h"])
    w1a = w1a.at[ci, hid_sz:hid_sz + out_sz].set(params["b_i2o"])
    w1a = w1a.at[ci, hid_sz + out_sz].set(1.0)         # "1" carrier lane into s1

    # Stage-1 weight, carried-hidden slab: rows = [hidden | (zeros for out/1/pad)].
    w1h = jnp.zeros((s1_pad, s1_pad), jnp.float32)
    w1h = w1h.at[:hid_sz, :hid_sz].set(w_i2h_t[ci:])
    w1h = w1h.at[:hid_sz, hid_sz:hid_sz + out_sz].set(w_i2o_t[ci:])

    # Stage-2 weight (o2o), bias folded into the carrier row, -1e30 bias on pad lanes.
    w2 = jnp.zeros((s1_pad, n_pad), jnp.float32)
    w2 = w2.at[:hid_sz + out_sz, :out_sz].set(params["w_o2o"].T)
    w2 = w2.at[hid_sz + out_sz, :out_sz].set(params["b_o2o"])
    if n_pad > out_sz:
        w2 = w2.at[hid_sz + out_sz, out_sz:].set(-1e30)

    return w1a, w1h, w2, a_pad, s1_pad, n_pad


def rnn_forward_seq(category, input_seq, hidden0, params, *, batch_block=None):
    """Run T RNN steps in one pallas_call.

    category:  (B, n_cat)      — same one-hot fed every step (tutorial semantics)
    input_seq: (T, B, in_sz)
    hidden0:   (B, hid)
    Returns (log_probs (T, B, out), last_hidden (B, hid)).
    """
    T, B, in_sz = input_seq.shape
    n_cat = category.shape[1]
    hid_sz = hidden0.shape[1]
    out_sz = params["w_i2o"].shape[0]

    w1a, w1h, w2, a_pad, s1_pad, n_pad = _build_fused_weights(
        params, n_cat, in_sz, hid_sz, out_sz)

    b_blk = B if batch_block is None else batch_block
    assert B % b_blk == 0 and b_blk % 8 == 0
    nb = B // b_blk

    # Padded per-step input slab: [category | input | 1 | 0-pad]  (built once, outside).
    xcat = jnp.zeros((T, B, a_pad), jnp.float32)
    xcat = xcat.at[:, :, :n_cat].set(jnp.broadcast_to(category[None], (T, B, n_cat)))
    xcat = xcat.at[:, :, n_cat:n_cat + in_sz].set(input_seq)
    xcat = xcat.at[:, :, n_cat + in_sz].set(1.0)

    # Initial hidden, padded to the lane-dense carry slab.
    h0 = jnp.zeros((B, s1_pad), jnp.float32).at[:, :hid_sz].set(hidden0)

    flops = 2 * T * B * (a_pad * s1_pad + s1_pad * s1_pad + s1_pad * n_pad)
    bytes_accessed = 4 * (T * B * a_pad + B * s1_pad + a_pad * s1_pad
                          + s1_pad * s1_pad + s1_pad * n_pad
                          + T * B * n_pad + B * s1_pad)
    cost = pl.CostEstimate(flops=flops, transcendentals=T * B * n_pad,
                           bytes_accessed=bytes_accessed)

    grid_spec = pltpu.PrefetchScalarGridSpec(
        num_scalar_prefetch=0,
        grid=(nb, T),                                  # batch blocks outer, time inner
        in_specs=[
            pl.BlockSpec((1, b_blk, a_pad), lambda b, t: (t, b, 0)),   # per-step input
            pl.BlockSpec((b_blk, s1_pad), lambda b, t: (b, 0)),        # h0
            pl.BlockSpec((a_pad, s1_pad), lambda b, t: (0, 0)),        # W1a (resident)
            pl.BlockSpec((s1_pad, s1_pad), lambda b, t: (0, 0)),       # W1h (resident)
            pl.BlockSpec((s1_pad, n_pad), lambda b, t: (0, 0)),        # W2  (resident)
        ],
        out_specs=(
            pl.BlockSpec((1, b_blk, n_pad), lambda b, t: (t, b, 0)),   # per-step log-probs
            pl.BlockSpec((b_blk, s1_pad), lambda b, t: (b, 0)),        # last hidden slab
        ),
        scratch_shapes=[pltpu.VMEM((b_blk, s1_pad), jnp.float32)],     # carried hidden
    )

    out_pad, hlast_pad = pl.pallas_call(
        rnn_seq_kernel,
        out_shape=(jax.ShapeDtypeStruct((T, B, n_pad), jnp.float32),
                   jax.ShapeDtypeStruct((B, s1_pad), jnp.float32)),
        grid_spec=grid_spec,
        compiler_params=pltpu.CompilerParams(
            dimension_semantics=("parallel", "arbitrary")),
        cost_estimate=cost,
    )(xcat, h0, w1a, w1h, w2)

    return out_pad[:, :, :out_sz], hlast_pad[:, :hid_sz]


def rnn_forward(category, input_data, hidden, params):
    """Single step == the PyTorch module's forward(category, input, hidden)."""
    out_seq, hid_new = rnn_forward_seq(category, input_data[None], hidden, params)
    return out_seq[0], hid_new


# ----------------------------- pure-JAX reference ------------------------------

def rnn_step_reference(category, input_data, hidden, params):
    combined = jnp.concatenate([category, input_data, hidden], axis=1)
    hid_new = combined @ params["w_i2h"].T + params["b_i2h"]
    output = combined @ params["w_i2o"].T + params["b_i2o"]
    out_comb = jnp.concatenate([hid_new, output], axis=1)
    output = out_comb @ params["w_o2o"].T + params["b_o2o"]
    return jax.nn.log_softmax(output, axis=1), hid_new


def rnn_reference_seq(category, input_seq, hidden, params):
    outs = []
    for t in range(input_seq.shape[0]):
        out, hidden = rnn_step_reference(category, input_seq[t], hidden, params)
        outs.append(out)
    return jnp.stack(outs), hidden


def init_params(key, n_categories, input_size, hidden_size, output_size):
    """Deterministic PyTorch-Linear-style uniform(-1/sqrt(fan_in), 1/sqrt(fan_in)) init."""
    combined_in = n_categories + input_size + hidden_size
    o2o_in = hidden_size + output_size
    ks = jax.random.split(key, 6)

    def lin(kw, kb, out_f, in_f):
        bound = 1.0 / jnp.sqrt(jnp.float32(in_f))
        w = jax.random.uniform(kw, (out_f, in_f), jnp.float32, -bound, bound)
        b = jax.random.uniform(kb, (out_f,), jnp.float32, -bound, bound)
        return w, b

    w_i2h, b_i2h = lin(ks[0], ks[1], hidden_size, combined_in)
    w_i2o, b_i2o = lin(ks[2], ks[3], output_size, combined_in)
    w_o2o, b_o2o = lin(ks[4], ks[5], output_size, o2o_in)
    return {"w_i2h": w_i2h, "b_i2h": b_i2h,
            "w_i2o": w_i2o, "b_i2o": b_i2o,
            "w_o2o": w_o2o, "b_o2o": b_o2o}


if __name__ == "__main__":
    # Small synthetic sizes consistent with the module's forward.  Batch is 8 to fill
    # the f32 sublane minimum; T=8 characters exercised inside one pallas_call.
    B = 8
    T = 8
    n_categories = 8
    input_size = 16
    hidden_size = 32
    output_size = 16

    key = jax.random.PRNGKey(0)
    k_cat, k_x, k_params = jax.random.split(key, 3)

    category = jax.nn.one_hot(
        jax.random.randint(k_cat, (B,), 0, n_categories), n_categories,
        dtype=jnp.float32)
    input_seq = jax.random.normal(k_x, (T, B, input_size), jnp.float32)
    hidden0 = jnp.zeros((B, hidden_size), jnp.float32)  # initHidden()

    params = init_params(k_params, n_categories, input_size, hidden_size, output_size)

    # Full sequence in one pallas_call (weights VMEM-resident, hidden carried in scratch).
    out_seq, hid_last = rnn_forward_seq(category, input_seq, hidden0, params)
    out_seq = jax.block_until_ready(out_seq)
    hid_last = jax.block_until_ready(hid_last)

    ref_seq, ref_hid = rnn_reference_seq(category, input_seq, hidden0, params)
    assert out_seq.shape == (T, B, output_size) and hid_last.shape == (B, hidden_size)
    assert jnp.allclose(out_seq, ref_seq, atol=1e-4, rtol=1e-4)
    assert jnp.allclose(hid_last, ref_hid, atol=1e-4, rtol=1e-4)

    # Single-step path (== the PyTorch module's forward signature).
    out1, hid1 = rnn_forward(category, input_seq[0], hidden0, params)
    out1 = jax.block_until_ready(out1)
    ref1, ref_h1 = rnn_step_reference(category, input_seq[0], hidden0, params)
    assert jnp.allclose(out1, ref1, atol=1e-5, rtol=1e-5)
    assert jnp.allclose(hid1, ref_h1, atol=1e-5, rtol=1e-5)

    print("KERNEL_OK")
</pallas_src>

<mosaic_0001>
module attributes {stable_mosaic.version = 11 : i64} {
  func.func @rnn_seq_kernel(%arg0: i32, %arg1: i32, %arg2: memref<1x8x128xf32, #tpu.memory_space<vmem>>, %arg3: memref<8x128xf32, #tpu.memory_space<vmem>>, %arg4: memref<128x128xf32, #tpu.memory_space<vmem>>, %arg5: memref<128x128xf32, #tpu.memory_space<vmem>>, %arg6: memref<128x128xf32, #tpu.memory_space<vmem>>, %arg7: memref<1x8x128xf32, #tpu.memory_space<vmem>>, %arg8: memref<8x128xf32, #tpu.memory_space<vmem>>, %arg9: memref<8x128xf32, #tpu.memory_space<vmem>>) attributes {dimension_semantics = [#tpu.dimension_semantics<parallel>, #tpu.dimension_semantics<arbitrary>], iteration_bounds = array<i64: 1, 8>, scalar_prefetch = 0 : i64, scratch_operands = 1 : i64, tpu.core_type = #tpu.core_type<tc>, window_params = [{transform_indices = @transform_0, window_bounds = array<i64: 1, 8, 128>}, {transform_indices = @transform_1, window_bounds = array<i64: 8, 128>}, {pipeline_mode = #tpu.pipeline_mode<synchronous>, transform_indices = @transform_2, window_bounds = array<i64: 128, 128>}, {pipeline_mode = #tpu.pipeline_mode<synchronous>, transform_indices = @transform_3, window_bounds = array<i64: 128, 128>}, {pipeline_mode = #tpu.pipeline_mode<synchronous>, transform_indices = @transform_4, window_bounds = array<i64: 128, 128>}, {transform_indices = @transform_5, window_bounds = array<i64: 1, 8, 128>}, {transform_indices = @transform_6, window_bounds = array<i64: 8, 128>}]} {
    %c0_i32 = arith.constant 0 : i32
    %0 = arith.cmpi eq, %arg1, %c0_i32 : i32
    %1 = arith.extui %0 : i1 to i32
    %c0_i32_0 = arith.constant 0 : i32
    %2 = arith.cmpi ne, %1, %c0_i32_0 : i32
    scf.if %2 {
      %c0_22 = arith.constant 0 : index
      %c0_23 = arith.constant 0 : index
      %28 = vector.load %arg3[%c0_22, %c0_23] : memref<8x128xf32, #tpu.memory_space<vmem>>, vector<8x128xf32>
      %c0_24 = arith.constant 0 : index
      %c0_25 = arith.constant 0 : index
      %29 = vector.load %arg9[%c0_24, %c0_25] : memref<8x128xf32, #tpu.memory_space<vmem>>, vector<8x128xf32>
      tpu.vector_store %arg9[%c0_24, %c0_25], %28 {strides = array<i32>} : memref<8x128xf32, #tpu.memory_space<vmem>>, vector<8x128xf32>,
    } else {
    }
    %c0 = arith.constant 0 : index
    %c0_1 = arith.constant 0 : index
    %c0_2 = arith.constant 0 : index
    %3 = vector.load %arg2[%c0, %c0_1, %c0_2] : memref<1x8x128xf32, #tpu.memory_space<vmem>>, vector<1x8x128xf32>
    %4 = vector.shape_cast %3 : vector<1x8x128xf32> to vector<8x128xf32>
    %c0_3 = arith.constant 0 : index
    %c0_4 = arith.constant 0 : index
    %5 = vector.load %arg4[%c0_3, %c0_4] : memref<128x128xf32, #tpu.memory_space<vmem>>, vector<128x128xf32>
    %cst = arith.constant dense<0.000000e+00> : vector<8x128xf32>
    %6 = tpu.matmul %4, %5, %cst {dimension_numbers = #tpu.dot_dimension_numbers<[1], [0], [0], [1], [0, 0, 1, 1], [], []>} : vector<8x128xf32>, vector<128x128xf32>, vector<8x128xf32> -> vector<8x128xf32>
    %c0_5 = arith.constant 0 : index
    %c0_6 = arith.constant 0 : index
    %7 = vector.load %arg9[%c0_5, %c0_6] : memref<8x128xf32, #tpu.memory_space<vmem>>, vector<8x128xf32>
    %c0_7 = arith.constant 0 : index
    %c0_8 = arith.constant 0 : index
    %8 = vector.load %arg5[%c0_7, %c0_8] : memref<128x128xf32, #tpu.memory_space<vmem>>, vector<128x128xf32>
    %cst_9 = arith.constant dense<0.000000e+00> : vector<8x128xf32>
    %9 = tpu.matmul %7, %8, %cst_9 {dimension_numbers = #tpu.dot_dimension_numbers<[1], [0], [0], [1], [0, 0, 1, 1], [], []>} : vector<8x128xf32>, vector<128x128xf32>, vector<8x128xf32> -> vector<8x128xf32>
    %10 = arith.addf %6, %9 : vector<8x128xf32>
    %c0_10 = arith.constant 0 : index
    %c0_11 = arith.constant 0 : index
    %11 = vector.load %arg6[%c0_10, %c0_11] : memref<128x128xf32, #tpu.memory_space<vmem>>, vector<128x128xf32>
    %cst_12 = arith.constant dense<0.000000e+00> : vector<8x128xf32>
    %12 = tpu.matmul %10, %11, %cst_12 {dimension_numbers = #tpu.dot_dimension_numbers<[1], [0], [0], [1], [0, 0, 1, 1], [], []>} : vector<8x128xf32>, vector<128x128xf32>, vector<8x128xf32> -> vector<8x128xf32>
    %cst_13 = arith.constant dense<0xFF800000> : vector<8xf32>
    %13 = vector.multi_reduction <maximumf>, %12, %cst_13 [1] : vector<8x128xf32> to vector<8xf32>
    %14 = vector.shape_cast %13 : vector<8xf32> to vector<8x1xf32>
    %15 = vector.broadcast %14 : vector<8x1xf32> to vector<8x128xf32>
    %16 = arith.subf %12, %15 : vector<8x128xf32>
    %17 = math.exp %16 : vector<8x128xf32>
    %cst_14 = arith.constant dense<0.000000e+00> : vector<8xf32>
    %18 = vector.multi_reduction <add>, %17, %cst_14 [1] : vector<8x128xf32> to vector<8xf32>
    %19 = vector.shape_cast %18 : vector<8xf32> to vector<8x1xf32>
    %20 = math.log %19 : vector<8x1xf32>
    %21 = vector.broadcast %20 : vector<8x1xf32> to vector<8x128xf32>
    %22 = arith.subf %16, %21 : vector<8x128xf32>
    %c0_15 = arith.constant 0 : index
    %c0_16 = arith.constant 0 : index
    %c0_17 = arith.constant 0 : index
    %23 = vector.load %arg7[%c0_15, %c0_16, %c0_17] : memref<1x8x128xf32, #tpu.memory_space<vmem>>, vector<1x8x128xf32>
    %24 = vector.shape_cast %23 : vector<1x8x128xf32> to vector<8x128xf32>
    %25 = vector.shape_cast %22 : vector<8x128xf32> to vector<1x8x128xf32>
    tpu.vector_store %arg7[%c0_15, %c0_16, %c0_17], %25 {strides = array<i32>} : memref<1x8x128xf32, #tpu.memory_space<vmem>>, vector<1x8x128xf32>,
    %c0_18 = arith.constant 0 : index
    %c0_19 = arith.constant 0 : index
    %26 = vector.load %arg9[%c0_18, %c0_19] : memref<8x128xf32, #tpu.memory_space<vmem>>, vector<8x128xf32>
    tpu.vector_store %arg9[%c0_18, %c0_19], %10 {strides = array<i32>} : memref<8x128xf32, #tpu.memory_space<vmem>>, vector<8x128xf32>,
    %c0_20 = arith.constant 0 : index
    %c0_21 = arith.constant 0 : index
    %27 = vector.load %arg8[%c0_20, %c0_21] : memref<8x128xf32, #tpu.memory_space<vmem>>, vector<8x128xf32>
    tpu.vector_store %arg8[%c0_20, %c0_21], %10 {strides = array<i32>} : memref<8x128xf32, #tpu.memory_space<vmem>>, vector<8x128xf32>,
    return
  }
  func.func @transform_0(%arg0: i32, %arg1: i32) -> (i32, i32, i32) {
    %c0_i32 = arith.constant 0 : i32
    %c0_i32_0 = arith.constant 0 : i32
    return %arg1, %arg0, %c0_i32 : i32, i32, i32
  }
  func.func @transform_1(%arg0: i32, %arg1: i32) -> (i32, i32) {
    %c0_i32 = arith.constant 0 : i32
    %c0_i32_0 = arith.constant 0 : i32
    return %arg0, %c0_i32 : i32, i32
  }
  func.func @transform_2(%arg0: i32, %arg1: i32) -> (i32, i32) {
    %c0_i32 = arith.constant 0 : i32
    %c0_i32_0 = arith.constant 0 : i32
    %c0_i32_1 = arith.constant 0 : i32
    return %c0_i32, %c0_i32_0 : i32, i32
  }
  func.func @transform_3(%arg0: i32, %arg1: i32) -> (i32, i32) {
    %c0_i32 = arith.constant 0 : i32
    %c0_i32_0 = arith.constant 0 : i32
    %c0_i32_1 = arith.constant 0 : i32
    return %c0_i32, %c0_i32_0 : i32, i32
  }
  func.func @transform_4(%arg0: i32, %arg1: i32) -> (i32, i32) {
    %c0_i32 = arith.constant 0 : i32
    %c0_i32_0 = arith.constant 0 : i32
    %c0_i32_1 = arith.constant 0 : i32
    return %c0_i32, %c0_i32_0 : i32, i32
  }
  func.func @transform_5(%arg0: i32, %arg1: i32) -> (i32, i32, i32) {
    %c0_i32 = arith.constant 0 : i32
    %c0_i32_0 = arith.constant 0 : i32
    return %arg1, %arg0, %c0_i32 : i32, i32, i32
  }
  func.func @transform_6(%arg0: i32, %arg1: i32) -> (i32, i32) {
    %c0_i32 = arith.constant 0 : i32
    %c0_i32_0 = arith.constant 0 : i32
    return %arg0, %c0_i32 : i32, i32
  }
}

</mosaic_0001>

<bundles_post_ra>
// kernel: tpu_custom_call.1
= control target key start
LH: loop header
LB: loop body
LE: loop exit
PB: predicated region body
PF: predicated region fallthrough
CT: control target
= control target key end

     0   :  { %s1655_s0 = inlined_call_operand.hbm [shape: f32[8,8,128], index: 0, kind: input, shape index: {}]   ;;  %s1656_s1 = inlined_call_operand.hbm [shape: f32[8,128], index: 1, kind: input, shape index: {}]   ;;  %s1657_s2 = inlined_call_operand.hbm [shape: f32[128,128], index: 2, kind: input, shape index: {}]   ;;  %s1658_s3 = inlined_call_operand.hbm [shape: f32[128,128], index: 3, kind: input, shape index: {}]   ;;  %s1659_s4 = inlined_call_operand.hbm [shape: f32[128,128], index: 4, kind: input, shape index: {}]   ;;  %s1660_s5 = inlined_call_operand.hbm [shape: f32[8,8,128], index: 5, kind: output, shape index: {0}]   ;;  %s1661_s6 = inlined_call_operand.hbm [shape: f32[8,128], index: 6, kind: output, shape index: {1}]  }
   0x1   :  { %1665 = sst [smem:[#allocation20_spill]] %s1656_s1 }
   0x2   :  { %1666 = sst [smem:[#allocation21_spill]] %s1657_s2 }
   0x3   :  { %1667 = sst [smem:[#allocation22_spill]] %s1658_s3 }
   0x4   :  { %1668 = sst [smem:[#allocation23_spill]] %s1659_s4 }
   0x5   :  { %12 = vsyncpa [#allocation4], 0 }
   0x6   :  { %14 = vsyncpa [#allocation4 + $0x1], 0 }
   0x7   :  { %15 = vsyncpa [#allocation7], 0 }
   0x8   :  { %16 = vsyncpa [#allocation10], 0 }
   0x9   :  { %17 = vsyncpa [#allocation5], 0 }
   0xa   :  { %19 = vsyncpa [#allocation5 + $0x1], 0 }
   0xb   :  { %20 = vsyncpa [#allocation14], 0  ;;  %s1385_s21 = smov 0   ;;  %s1387_s22 = smov 0  }
   0xc   :  { %s1389_s23 = smov 0   ;;  %s1391_s24 = smov 0  }
   0xd   :  { %s1393_s25 = smov 0   ;;  %s1395_s26 = smov 0  }
   0xe LB: > { %s791_s27 = sadd.s32 4294967295, %s1337_s26   ;;  %p793_p0 = scmp.ge.s32.totalorder %s1337_s26, 1  ;;  %s1337_s26 = sphi %s1395_s26, %s26_s26   ;;  %s1333_s25 = sphi %s1393_s25, %s1690_s25   ;;  %s1329_s24 = sphi %s1391_s24, %s1689_s24   ;;  %s1325_s23 = sphi %s1389_s23, %s1688_s23   ;;  %s1321_s22 = sphi %s1387_s22, %s1687_s22   ;;  %s1317_s21 = sphi %s1385_s21, %s1686_s21  }
   0xf   : > { %p1419_p1 = scmp.eq.s32.totalorder %s791_s27, 0  ;;  %p214_p2 = scmp.lt.s32.totalorder %s1337_s26, 9 }
  0x10   : > { %s1339_s30 = smov [#allocation6]   ;;  %s1340_s9 = smov [#allocation9]  }
  0x11   : > { %s1669_s28 = scalar_select %p1419_p1, 1, 0 }
  0x12   : > { %p1424_p3 = pnand %p793_p0, %p214_p2  ;;  %s229_s7 = sshll.u32 %s1339_s30, 4  ;;  %s230_s7 = int_to_ptr.vmem [resolvable:$true] %s229_s7 }
  0x13   : > { %s252_s10 = sshll.u32 %s1340_s9, 4  ;;  %s1341_s11 = smov [#allocation8]   ;;  %s253_s10 = int_to_ptr.vmem [resolvable:$true] %s252_s10 }
  0x14   : > { %s1670_s29 = scalar_select %p1424_p3, 1, 0 }
  0x15   : > { %p995_p4 = pneg %p1424_p3  ;;  %s239_s12 = sshll.u32 %s1341_s11, 4  ;;  %s240_s12 = int_to_ptr.vmem [resolvable:$true] %s239_s12 }
  0x16   : > { %s1100_s13 = scalar_lea.vmem %s230_s7, 128  ;;  %p1108_p10 = scmp.lt.s32.totalorder %s230_s7, %s230_s7 }
  0x17   : > { %p1432_p5 = pnand %p995_p4, %p1419_p1  ;;  %p1101_p7 = scmp.ne.s32.totalorder %s230_s7, %s1100_s13 }
  0x18   : > { %p1109_p11 = scmp.lt.s32.totalorder %s1100_s13, %s1100_s13 }
  0x19   : > { %p1091_p6 = pneg %p1432_p5 }
  0x1a   : > { %p1110_p12 = por %p1109_p11, %p1108_p10 }
  0x1b   : > { %p1103_p8 = pnand %p1101_p7, %p1091_p6 }
  0x1d   : > { %p1104_p9 = pneg %p1103_p8 }
  0x1f   : > { %p1111_p13 = pnand %p1110_p12, %p1104_p9 }
  0x21   : > { %1114 = shalt.err (!%p1111_p13)
}
  0x22   : > { %s1672_s1 = sld [smem:[#allocation20_spill]]  ;;  %s1126_s16 = scalar_lea.vmem %s253_s10, 2048 }
  0x23   : > { %p1127_p0 = scmp.ne.s32.totalorder %s253_s10, %s1126_s16  ;;  %p1134_p7 = scmp.lt.s32.totalorder %s253_s10, %s253_s10 }
  0x24   : > { %p1135_p8 = scmp.lt.s32.totalorder %s1126_s16, %s1126_s16 }
  0x25   : > { %p1129_p2 = pnand %p1127_p0, %p1091_p6 }
  0x26   : > { %p1136_p3 = por %p1135_p8, %p1134_p7 }
  0x27   : > { %p1130_p4 = pneg %p1129_p2 }
  0x28   : > { %998 = dma.hbm_to_vmem [thread:$0]  (!%p1432_p5), %s1672_s1, 128, %s230_s7, [#allocation7]  }
  0x29   : > { %p1137_p1 = pnand %p1136_p3, %p1130_p4 }
  0x2b   : > { %1140 = shalt.err (!%p1137_p1)
}
  0x2c   : > { %s1342_s17 = smov 128   ;;  %s1343_s18 = smov 8  }
  0x2d   : > { %s1673_s3 = sld [smem:[#allocation22_spill]]  ;;  %s1152_s30 = scalar_lea.vmem %s240_s12, 2048 }
  0x2e   : > { %p1153_p9 = scmp.ne.s32.totalorder %s240_s12, %s1152_s30  ;;  %p1160_p12 = scmp.lt.s32.totalorder %s240_s12, %s240_s12 }
  0x2f   : > { %p1161_p13 = scmp.lt.s32.totalorder %s1152_s30, %s1152_s30 }
  0x30   : > { %p1155_p10 = pnand %p1153_p9, %p1091_p6 }
  0x31   : > { %p1162_p3 = por %p1161_p13, %p1160_p12 }
  0x32   : > { %p1156_p11 = pneg %p1155_p10 }
  0x33   : > { %1004 = dma.hbm_to_vmem [thread:$0]  (!%p1432_p5), %s1673_s3, 2048, %s253_s10, [#allocation10], %s1342_s17, %s1342_s17, %s1343_s18  }
  0x34   : > { %p1163_p1 = pnand %p1162_p3, %p1156_p11 }
  0x36   : > { %1166 = shalt.err (!%p1163_p1)
}
  0x37   : > { %s1674_s2 = sld [smem:[#allocation21_spill]]  ;;  %s1344_s10 = smov [#allocation11]  }
  0x38   : > { %s265_s11 = sshll.u32 %s1344_s10, 4  ;;  %s266_s11 = int_to_ptr.vmem [resolvable:$true] %s265_s11 }
  0x39   : > { %s1178_s13 = scalar_lea.vmem %s266_s11, 2048  ;;  %p1186_p7 = scmp.lt.s32.totalorder %s266_s11, %s266_s11 }
  0x3a   : > { %p1179_p0 = scmp.ne.s32.totalorder %s266_s11, %s1178_s13  ;;  %p1187_p8 = scmp.lt.s32.totalorder %s1178_s13, %s1178_s13 }
  0x3c   : > { %p1181_p2 = pnand %p1179_p0, %p1091_p6  ;;  %p1188_p9 = por %p1187_p8, %p1186_p7 }
  0x3d   : > { %1001 = dma.hbm_to_vmem [thread:$0]  (!%p1432_p5), %s1674_s2, 2048, %s240_s12, [#allocation7], %s1342_s17, %s1342_s17, %s1343_s18  }
  0x3e   : > { %p1182_p4 = pneg %p1181_p2 }
  0x40   : > { %p1189_p10 = pnand %p1188_p9, %p1182_p4 }
  0x42   : > { %1192 = shalt.err (!%p1189_p10)
}
  0x43   : > { %s1675_s4 = sld [smem:[#allocation23_spill]]  ;;  %s792_s12 = sadd.s32 4294967294, %s1337_s26  }
  0x44   : > { %s35_s16 = sadd.s32 1, %s1333_s25  ;;  %s47_s8 = sadd.s32 1, %s1325_s23 }
  0x45   : > { %p36_p6 = scmp.ge.s32.totalorder %s35_s16, 8  ;;  %p54_p11 = scmp.ne.s32.totalorder %s1325_s23, %s1321_s22 }
  0x46   : > { %p55_p12 = scmp.eq.s32.totalorder %s1337_s26, 0  ;;  %p60_p3 = scmp.ne.s32.totalorder %s1321_s22, %s1317_s21 }
  0x47   : > { %s1692_s16 = smov (%p36_p6, %s35_s16), 0  ;;  %p1678_p0 = scmp.ne.s32.totalorder %s1669_s28, 0 }
  0x48   : > { %p1478_p13 = por %p55_p12, %p54_p11  ;;  %p181_p7 = scmp.eq.s32.totalorder %s792_s12, 7 }
  0x49   : > { %1007 = dma.hbm_to_vmem [thread:$0]  (!%p1432_p5), %s1675_s4, 2048, %s266_s11, [#allocation10], %s1342_s17, %s1342_s17, %s1343_s18  }
  0x4a   : > { %s42_s17 = ssub.s32 %s1333_s25, %s1692_s16  ;;  %p1488_p5 = scmp.eq.s32.totalorder %s791_s27, 7 }
  0x4b   : > { %p45_p1 = scmp.eq.s32.totalorder %s42_s17, 0  ;;  %p1494_p2 = por %p1678_p0, %p60_p3 }
  0x4c   : > { %p1500_p4 = por %p1488_p5, %p54_p11  ;;  %p1507_p8 = por %p181_p7, %p60_p3 }
  0x4d   : > { %s1505_s7 = scalar_select %p45_p1, %s1325_s23, %s47_s8  }
  0x4e   : > { %s1681_s27 = scalar_select %p1507_p8, 1, 0 }
  0x4f   : > { %p1020_p9 = scmp.lt.s32.totalorder %s1337_s26, 8  ;;  %s279_s9 = sand.u32 1, %s1325_s23  }
  0x50   : > { %s800_s10 = sshll.u32 %s1333_s25, 7  ;;  %s799_s11 = sshll.u32 %s279_s9, 3 }
  0x51   : > { %s289_s15 = scalar_lea.hbm %s1655_s0, %s800_s10  ;;  %s283_s17 = scalar_lea.vmem [#allocation3], %s799_s11 }
  0x52   : > { %s291_s1 = sshll.u32 %s283_s17, 4  ;;  %p1519_p10 = pnand %p1020_p9, %p1478_p13  ;;  %s292_s1 = int_to_ptr.vmem [resolvable:$true] %s291_s1 }
  0x53   : > { %s280_s12 = scalar_lea.sflag [#allocation4], %s279_s9  ;;  %s1206_s8 = scalar_lea.vmem %s292_s1, 128 }
  0x54   : > { %p1195_p6 = pneg %p1519_p10  ;;  %p1207_p11 = scmp.ne.s32.totalorder %s292_s1, %s1206_s8 }
  0x55   : > { %s1345_s3 = smov [#allocation3]  }
  0x56   : > { %p1209_p12 = pnand %p1207_p11, %p1195_p6  ;;  %s1211_s4 = sshll.u32 %s1345_s3, 4  ;;  %s1212_s4 = int_to_ptr.vmem [resolvable:$false] %s1211_s4 }
  0x57   : > { %s1213_s10 = scalar_lea.vmem %s1212_s4, 256  ;;  %p1214_p1 = scmp.lt.s32.totalorder %s292_s1, %s1212_s4 }
  0x58   : > { %p1210_p3 = pneg %p1209_p12  ;;  %p1215_p0 = scmp.lt.s32.totalorder %s1213_s10, %s1206_s8 }
  0x5a   : > { %p1216_p7 = por %p1215_p0, %p1214_p1 }
  0x5c   : > { %p1217_p13 = pnand %p1216_p7, %p1210_p3 }
  0x5e   : > { %1220 = shalt.err (!%p1217_p13)
}
  0x5f   : > { %1011 = dma.hbm_to_vmem [thread:$0]  (!%p1519_p10), %s289_s15, 128, %s292_s1, %s280_s12  }
  0x60   : > { %p1683_p9 = scmp.ne.s32.totalorder %s1670_s29, 0 }
  0x61   : > { %s1530_s19 = sand.u32 (!%p1683_p9), 1, %s1321_s22  }
  0x62   : > { %300 = sbr.rel (%p1683_p9) target bundleno = 867 (0x363), region = 40  ;;  %s802_s3 = sshll.u32 (!%p1683_p9), %s1530_s19, 3 }
  0x63   : > { %s303_s9 = scalar_lea.sflag (!%p1683_p9), [#allocation4], %s1530_s19  ;;  %s1534_s11 = scalar_lea.vmem (!%p1683_p9), [#allocation3], %s802_s3 }
  0x67   : > { %1296 = dma.done.wait (%p1494_p2), %s303_s9, 128  }
  0x68   : > { %1298 = vsyncadd (%p1494_p2), %s303_s9, 4294967168  ;;  %p1684_p10 = scmp.ne.s32.totalorder %s1669_s28, 0 }
  0x6a   : > { %1300 = dma.done.wait (%p1684_p10), [#allocation7], 2176  }
  0x6b   : > { %1302 = vsyncadd (%p1684_p10), [#allocation7], 4294965120 }
  0x6c   : > { %1304 = dma.done.wait (%p1684_p10), [#allocation10], 4096  }
  0x6d   : > { %1306 = vsyncadd (%p1684_p10), [#allocation10], 4294963200  ;;  %s1548_s1 = scalar_lea.vmem [#allocation12], %s802_s3  ;;  %p808_p6 = scmp.ne.s32.totalorder %s1329_s24, 0 }
  0x6f   : > { %354 = sbr.rel (%p808_p6) target bundleno = 118 (0x76), region = 64 }
  0x74   : > { %v355_v0 = vld [vmem:[#allocation6] sm:$0xff] }
  0x75   : > { %356 = vst [vmem:[#allocation2] sm:$0xff] %v355_v0 }
  0x76 PF: > { %v390_v1 = vld [vmem:[#allocation9 + $0x78] sm:$0xff]  ;;  %v1346_v3 = vmov 0.0   ;;  %v389_v4 = vld [vmem:[#allocation9 + $0x70] sm:$0xff]  ;;  %v388_v6 = vld [vmem:[#allocation9 + $0x68] sm:$0xff]  ;;  %vm1347_vm0 = vmmov 0   ;;  %s1348_s2 = smov [#allocation13]  }
  0x77   : > { %v373_v2 = vld [vmem:[#allocation8 + $0x78] sm:$0xff]  ;;  %866 = vmatprep.subr.mxu0 %v1346_v3  ;;  %901 = vmatprep.subr.mxu1 %v1346_v3  ;;  %v372_v5 = vld [vmem:[#allocation8 + $0x70] sm:$0xff]  ;;  %v371_v7 = vld [vmem:[#allocation8 + $0x68] sm:$0xff]  ;;  %s658_s4 = sshll.u32 %s1348_s2, 4  ;;  %s659_s4 = int_to_ptr.vmem [resolvable:$true] %s658_s4 }
  0x78   : > { %867 = vmatpush3.msra.mxu0 %v390_v1  ;;  %902 = vmatpush3.msra.mxu1 %v373_v2  ;;  %v387_v8 = vld [vmem:[#allocation9 + $0x60] sm:$0xff]  ;;  %v386_v10 = vld [vmem:[#allocation9 + $0x58] sm:$0xff]  ;;  %v385_v12 = vld [vmem:[#allocation9 + $0x50] sm:$0xff]  ;;  %s1221_s28 = scalar_lea.vmem %s659_s4, 128  ;;  %p1228_p3 = scmp.lt.s32.totalorder %s659_s4, %s659_s4 }
  0x79   : > { %868 = vmatprep.subr.mxu0 %v1346_v3  ;;  %903 = vmatprep.subr.mxu1 %v1346_v3  ;;  %v370_v9 = vld [vmem:[#allocation8 + $0x60] sm:$0xff]  ;;  %v369_v11 = vld [vmem:[#allocation8 + $0x58] sm:$0xff]  ;;  %v368_v13 = vld [vmem:[#allocation8 + $0x50] sm:$0xff]  ;;  %p1222_p2 = scmp.ne.s32.totalorder %s659_s4, %s1221_s28  ;;  %p1229_p1 = scmp.lt.s32.totalorder %s1221_s28, %s1221_s28 }
  0x7a   : > { %869 = vmatpush3.msra.mxu0 %v389_v4  ;;  %904 = vmatpush3.msra.mxu1 %v372_v5  ;;  %v384_v14 = vld [vmem:[#allocation9 + $0x48] sm:$0xff]  ;;  %v383_v16 = vld [vmem:[#allocation9 + $0x40] sm:$0xff]  ;;  %v382_v18 = vld [vmem:[#allocation9 + $0x38] sm:$0xff] }
  0x7b   : > { %870 = vmatprep.subr.mxu0 %v1346_v3  ;;  %905 = vmatprep.subr.mxu1 %v1346_v3  ;;  %v367_v15 = vld [vmem:[#allocation8 + $0x48] sm:$0xff]  ;;  %v366_v17 = vld [vmem:[#allocation8 + $0x40] sm:$0xff]  ;;  %v365_v19 = vld [vmem:[#allocation8 + $0x38] sm:$0xff]  ;;  %p1223_p11 = pnand %p1222_p2, %p1488_p5  ;;  %p1230_p0 = por %p1229_p1, %p1228_p3 }
  0x7c   : > { %871 = vmatpush3.msra.mxu0 %v388_v6  ;;  %906 = vmatpush3.msra.mxu1 %v371_v7  ;;  %v381_v20 = vld [vmem:[#allocation9 + $0x30] sm:$0xff]  ;;  %v380_v22 = vld [vmem:[#allocation9 + $0x28] sm:$0xff]  ;;  %v379_v24 = vld [vmem:[#allocation9 + $0x20] sm:$0xff] }
  0x7d   : > { %872 = vmatprep.subr.mxu0 %v1346_v3  ;;  %907 = vmatprep.subr.mxu1 %v1346_v3  ;;  %v364_v21 = vld [vmem:[#allocation8 + $0x30] sm:$0xff]  ;;  %v363_v23 = vld [vmem:[#allocation8 + $0x28] sm:$0xff]  ;;  %v362_v25 = vld [vmem:[#allocation8 + $0x20] sm:$0xff]  ;;  %p1224_p12 = pneg %p1223_p11 }
  0x7e   : > { %873 = vmatpush3.msra.mxu0 %v387_v8  ;;  %908 = vmatpush3.msra.mxu1 %v370_v9  ;;  %v378_v26 = vld [vmem:[#allocation9 + $0x18] sm:$0xff]  ;;  %v377_v28 = vld [vmem:[#allocation9 + $0x10] sm:$0xff]  ;;  %v376_v30 = vld [vmem:[#allocation9 + $0x8] sm:$0xff] }
  0x7f   : > { %874 = vmatprep.subr.mxu0 %v1346_v3  ;;  %909 = vmatprep.subr.mxu1 %v1346_v3  ;;  %v361_v27 = vld [vmem:[#allocation8 + $0x18] sm:$0xff]  ;;  %v360_v29 = vld [vmem:[#allocation8 + $0x10] sm:$0xff]  ;;  %v359_v31 = vld [vmem:[#allocation8 + $0x8] sm:$0xff]  ;;  %p1231_p7 = pnand %p1230_p0, %p1224_p12 }
  0x80   : > { %875 = vmatpush3.msra.mxu0 %v386_v10  ;;  %910 = vmatpush3.msra.mxu1 %v369_v11  ;;  %v375_v32 = vld [vmem:[#allocation9] sm:$0xff]  ;;  %v357_v35 = vld [vmem:[%s1534_s11] sm:$0xff]  ;;  %v546_v36 = vld [vmem:[#allocation11 + $0x78] sm:$0xff] }
  0x81   : > { %876 = vmatprep.subr.mxu0 %v1346_v3  ;;  %911 = vmatprep.subr.mxu1 %v1346_v3  ;;  %v358_v33 = vld [vmem:[#allocation8] sm:$0xff]  ;;  %v545_v37 = vld [vmem:[#allocation11 + $0x70] sm:$0xff]  ;;  %v544_v38 = vld [vmem:[#allocation11 + $0x68] sm:$0xff] }
  0x82   : > { %877 = vmatpush3.msra.mxu0 %v385_v12  ;;  %912 = vmatpush3.msra.mxu1 %v368_v13  ;;  %v374_v34 = vld [vmem:[#allocation2] sm:$0xff]  ;;  %v542_v40 = vld [vmem:[#allocation11 + $0x58] sm:$0xff]  ;;  %v541_v41 = vld [vmem:[#allocation11 + $0x50] sm:$0xff] }
  0x83   : > { %878 = vmatprep.subr.mxu0 %v1346_v3  ;;  %913 = vmatprep.subr.mxu1 %v1346_v3  ;;  %v543_v39 = vld [vmem:[#allocation11 + $0x60] sm:$0xff]  ;;  %v540_v42 = vld [vmem:[#allocation11 + $0x48] sm:$0xff]  ;;  %v538_v44 = vld [vmem:[#allocation11 + $0x38] sm:$0xff] }
  0x84   : > { %879 = vmatpush3.msra.mxu0 %v384_v14  ;;  %914 = vmatpush3.msra.mxu1 %v367_v15  ;;  %v539_v43 = vld [vmem:[#allocation11 + $0x40] sm:$0xff]  ;;  %v537_v45 = vld [vmem:[#allocation11 + $0x30] sm:$0xff]  ;;  %v536_v46 = vld [vmem:[#allocation11 + $0x28] sm:$0xff] }
  0x85   : > { %880 = vmatprep.subr.mxu0 %v1346_v3  ;;  %915 = vmatprep.subr.mxu1 %v1346_v3  ;;  %v535_v47 = vld [vmem:[#allocation11 + $0x20] sm:$0xff]  ;;  %v534_v48 = vld [vmem:[#allocation11 + $0x18] sm:$0xff]  ;;  %v533_v49 = vld [vmem:[#allocation11 + $0x10] sm:$0xff] }
  0x86   : > { %881 = vmatpush3.msra.mxu0 %v383_v16  ;;  %916 = vmatpush3.msra.mxu1 %v366_v17  ;;  %v532_v50 = vld [vmem:[#allocation11 + $0x8] sm:$0xff]  ;;  %v531_v51 = vld [vmem:[#allocation11] sm:$0xff] }
  0x87   : > { %882 = vmatprep.subr.mxu0 %v1346_v3  ;;  %917 = vmatprep.subr.mxu1 %v1346_v3 }
  0x88   : > { %883 = vmatpush3.msra.mxu0 %v382_v18  ;;  %918 = vmatpush3.msra.mxu1 %v365_v19 }
  0x89   : > { %884 = vmatprep.subr.mxu0 %v1346_v3  ;;  %919 = vmatprep.subr.mxu1 %v1346_v3 }
  0x8a   : > { %885 = vmatpush3.msra.mxu0 %v381_v20  ;;  %920 = vmatpush3.msra.mxu1 %v364_v21 }
  0x8b   : > { %886 = vmatprep.subr.mxu0 %v1346_v3  ;;  %921 = vmatprep.subr.mxu1 %v1346_v3 }
  0x8c   : > { %887 = vmatpush3.msra.mxu0 %v380_v22  ;;  %922 = vmatpush3.msra.mxu1 %v363_v23 }
  0x8d   : > { %888 = vmatprep.subr.mxu0 %v1346_v3  ;;  %923 = vmatprep.subr.mxu1 %v1346_v3 }
  0x8e   : > { %889 = vmatpush3.msra.mxu0 %v379_v24  ;;  %924 = vmatpush3.msra.mxu1 %v362_v25 }
  0x8f   : > { %890 = vmatprep.subr.mxu0 %v1346_v3  ;;  %925 = vmatprep.subr.mxu1 %v1346_v3 }
  0x90   : > { %891 = vmatpush3.msra.mxu0 %v378_v26  ;;  %926 = vmatpush3.msra.mxu1 %v361_v27 }
  0x91   : > { %892 = vmatprep.subr.mxu0 %v1346_v3  ;;  %927 = vmatprep.subr.mxu1 %v1346_v3 }
  0x92   : > { %893 = vmatpush3.msra.mxu0 %v377_v28  ;;  %928 = vmatpush3.msra.mxu1 %v360_v29 }
  0x93   : > { %894 = vmatprep.subr.mxu0 %v1346_v3  ;;  %929 = vmatprep.subr.mxu1 %v1346_v3 }
  0x94   : > { %895 = vmatpush3.msra.mxu0 %v376_v30  ;;  %930 = vmatpush3.msra.mxu1 %v359_v31 }
  0x95   : > { %896 = vmatprep.subr.mxu0 %v1346_v3  ;;  %931 = vmatprep.subr.mxu1 %v1346_v3 }
  0x96   : > { %897 = vmatpush3.msra.mxu0 %v375_v32  ;;  %898 = vmatprep.mubr.msk.f32.mxu0 %vm1347_vm0, %v1346_v3 }
  0x97   : > { %932 = vmatpush3.msra.mxu1 %v358_v33  ;;  %933 = vmatprep.mubr.msk.f32.mxu1 %vm1347_vm0, %v1346_v3 }
  0x98   : > { %899 = vmatmul.mubr.f32.vlgmr.msra.gmra.mxu0 %v374_v34  ;;  %934 = vmatmul.mubr.f32.vlgmr.msra.gmra.mxu1 %v357_v35 }
  0x99   : > { %936 = vmatprep.subr.mxu0 %v1346_v3  ;;  %968 = vmatprep.mubr.msk.f32.mxu0 %vm1347_vm0, %v1346_v3 }
  0x9a   : > { %937 = vmatpush3.msra.mxu0 %v546_v36 }
  0x9b   : > { %938 = vmatprep.subr.mxu0 %v1346_v3 }
  0x9c   : > { %939 = vmatpush3.msra.mxu0 %v545_v37 }
  0x9d   : > { %940 = vmatprep.subr.mxu0 %v1346_v3 }
  0x9e   : > { %941 = vmatpush3.msra.mxu0 %v544_v38 }
  0x9f   : > { %942 = vmatprep.subr.mxu0 %v1346_v3 }
  0xa0   : > { %943 = vmatpush3.msra.mxu0 %v543_v39 }
  0xa1   : > { %944 = vmatprep.subr.mxu0 %v1346_v3 }
  0xa2   : > { %945 = vmatpush3.msra.mxu0 %v542_v40 }
  0xa3   : > { %946 = vmatprep.subr.mxu0 %v1346_v3 }
  0xa4   : > { %947 = vmatpush3.msra.mxu0 %v541_v41 }
  0xa5   : > { %948 = vmatprep.subr.mxu0 %v1346_v3 }
  0xa6   : > { %949 = vmatpush3.msra.mxu0 %v540_v42 }
  0xa7   : > { %950 = vmatprep.subr.mxu0 %v1346_v3 }
  0xa8   : > { %951 = vmatpush3.msra.mxu0 %v539_v43 }
  0xa9   : > { %952 = vmatprep.subr.mxu0 %v1346_v3 }
  0xaa   : > { %953 = vmatpush3.msra.mxu0 %v538_v44 }
  0xab   : > { %954 = vmatprep.subr.mxu0 %v1346_v3 }
  0xac   : > { %955 = vmatpush3.msra.mxu0 %v537_v45 }
  0xad   : > { %956 = vmatprep.subr.mxu0 %v1346_v3 }
  0xae   : > { %957 = vmatpush3.msra.mxu0 %v536_v46 }
  0xaf   : > { %958 = vmatprep.subr.mxu0 %v1346_v3 }
  0xb0   : > { %959 = vmatpush3.msra.mxu0 %v535_v47 }
  0xb1   : > { %960 = vmatprep.subr.mxu0 %v1346_v3 }
  0xb2   : > { %961 = vmatpush3.msra.mxu0 %v534_v48 }
  0xb3   : > { %962 = vmatprep.subr.mxu0 %v1346_v3 }
  0xb4   : > { %963 = vmatpush3.msra.mxu0 %v533_v49 }
  0xb5   : > { %964 = vmatprep.subr.mxu0 %v1346_v3 }
  0xb6   : > { %965 = vmatpush3.msra.mxu0 %v532_v50 }
  0xb7   : > { %966 = vmatprep.subr.mxu0 %v1346_v3 }
  0xb8   : > { %967 = vmatpush3.msra.mxu0 %v531_v51 }
 0x158   : > { %v457_v52 = vpop.f32.mrf.mxu0  ;;  %v527_v53 = vpop.f32.mrf.mxu1 }
 0x159   : > { %v528_v54 = vadd.f32 %v527_v53, %v457_v52 }
 0x15a   : > { %v900_v55 = vpop.f32.mrf.mxu0  ;;  %v935_v56 = vpop.f32.mrf.mxu1 }
 0x15b   : > { %628 = vst [vmem:[#allocation2] sm:$0xff] %v528_v54  ;;  %629 = vst [vmem:[#allocation13] sm:$0xff] %v528_v54  ;;  %969 = vmatmul.mubr.f32.vlgmr.msra.gmra.mxu0 %v528_v54 }
 0x21b   : > { %v613_v57 = vpop.f32.mrf.mxu0 }
 0x21c   : > { %617 = vmax.xlane.f32.xlu0 %v613_v57 }
 0x21d   : > { %v970_v58 = vpop.f32.mrf.mxu0 }
 0x2a5   : > { %v618_v59 = vpop.xlane.xlu0 %617 }
 0x2a6   : > { %v619_v60 = vsub.f32 %v613_v57, %v618_v59 }
 0x2a8   : > { %v620_v61 = vmul.f32 1.442695, %v619_v60 }
 0x2aa   : > { %1085 = vpow2.f32 %v620_v61 }
 0x2b7   : > { %v1086_v62 = vpop.eup %1085 }
 0x2b8   : > { %622 = vadd.xlane.f32.xlu0 %v1086_v62 }
 0x2b9   : > { %1234 = shalt.err (!%p1231_p7)
}
 0x2ba   : > { %991 = dma.vmem_to_hbm [thread:$0]  (%p1488_p5), %s659_s4, 128, %s1661_s6, [#allocation14]  }
 0x2bb   : > { %s810_s13 = sshll.u32 %s1329_s24, 7  ;;  %s645_s14 = sshll.u32 %s1548_s1, 4  ;;  %s646_s14 = int_to_ptr.vmem [resolvable:$true] %s645_s14 }
 0x2bc   : > { %s643_s12 = scalar_lea.hbm %s1660_s5, %s810_s13  ;;  %s631_s8 = scalar_lea.sflag [#allocation5], %s1530_s19 }
 0x2bd   : > { %s1245_s10 = scalar_lea.vmem %s646_s14, 128  ;;  %s1349_s3 = smov [#allocation12]  }
 0x2be   : > { %p1246_p13 = scmp.ne.s32.totalorder %s646_s14, %s1245_s10  ;;  %s1249_s9 = sshll.u32 %s1349_s3, 4  ;;  %s1250_s9 = int_to_ptr.vmem [resolvable:$false] %s1249_s9 }
 0x2bf   : > { %s1251_s11 = scalar_lea.vmem %s1250_s9, 256  ;;  %p1252_p6 = scmp.lt.s32.totalorder %s646_s14, %s1250_s9 }
 0x2c0   : > { %p1247_p9 = pnand %p1246_p13, %p1500_p4  ;;  %p1253_p2 = scmp.lt.s32.totalorder %s1251_s11, %s1245_s10 }
 0x2c2   : > { %p1248_p10 = pneg %p1247_p9  ;;  %p1254_p11 = por %p1253_p2, %p1252_p6 }
 0x2c4   : > { %p1255_p12 = pnand %p1254_p11, %p1248_p10 }
 0x341   : > { %v623_v63 = vpop.xlane.xlu0 %622 }
 0x342   : > { %1087 = vlog2.f32 %v623_v63 }
 0x34f   : > { %v1088_v0 = vpop.eup %1087 }
 0x350   : > { %v625_v1 = vmul.f32 0.6931472, %v1088_v0 }
 0x352   : > { %v626_v2 = vsub.f32 %v619_v60, %v625_v1 }
 0x354   : > { %627 = vst [vmem:[%s1548_s1] sm:$0xff] %v626_v2 }
 0x355   : > { %1258 = shalt.err (!%p1255_p12)
}
 0x356   : > { %s1259_s24 = scalar_lea.hbm %s643_s12, 128  ;;  %s1263_s2 = scalar_lea.hbm %s1660_s5, 1024 }
 0x357   : > { %p1260_p3 = scmp.ne.s32.totalorder %s643_s12, %s1259_s24  ;;  %p1264_p7 = scmp.lt.s32.totalorder %s643_s12, %s1660_s5 }
 0x358   : > { %p1265_p13 = scmp.lt.s32.totalorder %s1263_s2, %s1259_s24 }
 0x359   : > { %p1261_p1 = pnand %p1260_p3, %p1500_p4 }
 0x35a   : > { %p1266_p9 = por %p1265_p13, %p1264_p7 }
 0x35b   : > { %p1262_p0 = pneg %p1261_p1 }
 0x35d   : > { %p1267_p8 = pnand %p1266_p9, %p1262_p0 }
 0x35f   : > { %1270 = shalt.err (!%p1267_p8)
}
 0x360   : > { %989 = dma.vmem_to_hbm [thread:$0]  (%p1500_p4), %s646_s14, 128, %s643_s12, %s631_s8  }
 0x361   : > { %1308 = dma.done.wait (%p1488_p5), [#allocation14], 128  }
 0x362   : > { %1310 = vsyncadd (%p1488_p5), [#allocation14], 4294967168 }
 0x363 PF: > { %p1027_p10 = scmp.ge.s32.totalorder %s1337_s26, 2  ;;  %s674_s29 = sand.u32 1, %s1317_s21  }
 0x364   : > { %p1685_p6 = scmp.ne.s32.totalorder %s1681_s27, 0  ;;  %s675_s20 = scalar_lea.sflag [#allocation5], %s674_s29 }
 0x366   : > { %p1013_p2 = pnand %p1027_p10, %p1685_p6 }
 0x368   : > { %p1014_p11 = pneg %p1013_p2 }
 0x36a   : > { %1312 = dma.done.wait (%p1014_p11), %s675_s20, 128  }
 0x36b   : > { %1314 = vsyncadd (%p1014_p11), %s675_s20, 4294967168  ;;  %s26_s26 = sadd.s32 1, %s1337_s26   ;;  %s1686_s21 = smov %s1321_s22 }
 0x36c   : > { %p23_p4 = scmp.ge.s32.totalorder %s26_s26, 10   ;;  %s1687_s22 = smov %s1325_s23 }
 0x36d   : > { %s1688_s23 = smov %s1505_s7  ;;  %s1689_s24 = smov %s1333_s25 }
 0x36e   : > { %s1690_s25 = smov %s1692_s16  ;;  %25 = sbr.rel (!%p23_p4) target bundleno = 14 (0xe), region = 115 }
 0x373   :  { %680 = vsyncpa [#allocation4], 1 }
 0x374   :  { %682 = vsyncpa [#allocation4 + $0x1], 1 }
 0x375   :  { %683 = vsyncpa [#allocation7], 1 }
 0x376   :  { %684 = vsyncpa [#allocation10], 1 }
 0x377   :  { %685 = vsyncpa [#allocation5], 1 }
 0x378   :  { %687 = vsyncpa [#allocation5 + $0x1], 1 }
 0x379   :  { %688 = vsyncpa [#allocation14], 1 }

</bundles_post_ra>
